<compile_context>
chip_gen: v6e
topology: v6e:2x2x1
jax: 0.10.0
libtpu: 0.0.40
codegen_flags: <defaults>
</compile_context>

<pallas_src>
import functools

import jax
import jax.numpy as jnp
from jax.experimental import pallas as pl
from jax.experimental.pallas import tpu as pltpu


LN_EPS = 1e-5


def _round_up(x: int, m: int) -> int:
    return ((x + m - 1) // m) * m


def _cdiv(a: int, b: int) -> int:
    return -(-a // b)


def _projector_mlp_kernel(x_ref, w1_ref, b1_ref, w2_ref, b2_ref, out_ref, z_ref):
    # x_ref:   [tm, d_in]        (native dtype, cast to bf16 in-kernel)
    # w1_ref:  [d_in, d_hidden]  (bf16)      b1_ref: [1, d_hidden] (f32)
    # w2_ref:  [d_hidden, tn]    (bf16, LayerNorm affine pre-folded)
    # b2_ref:  [1, tn]           (f32)
    # out_ref: [tm, tn]
    # z_ref:   [tm, d_hidden]    (bf16 VMEM scratch, reused across column tiles)
    j = pl.program_id(1)

    @pl.when(j == 0)
    def _():
        # ---- Linear1 (MXU, bf16 operands, f32 accumulate) + Tanh (EUP) ----
        h = jnp.dot(x_ref[...].astype(jnp.bfloat16), w1_ref[...],
                    preferred_element_type=jnp.float32)
        h = jnp.tanh(h + b1_ref[...])

        # ---- LayerNorm stats over hidden dim, f32, single pass.
        #      h in [-1, 1] after tanh, so E[h^2] - E[h]^2 has no cancellation issue.
        #      Affine (gamma/beta) is folded into W2'/b2' by the wrapper. ----
        mean = jnp.mean(h, axis=-1, keepdims=True)
        var = jnp.mean(h * h, axis=-1, keepdims=True) - mean * mean
        rs = jax.lax.rsqrt(var + LN_EPS)
        z_ref[...] = ((h - mean) * rs).astype(z_ref.dtype)

        # ---- Dropout: identity (eval-mode semantics) ----

    # ---- Linear2 (MXU) for this output-column tile ----
    out = jnp.dot(z_ref[...], w2_ref[...], preferred_element_type=jnp.float32)
    out_ref[...] = (out + b2_ref[...]).astype(out_ref.dtype)


@functools.partial(jax.jit, static_argnames=("tm", "tn", "out_dtype"))
def projector_mlp(x, w1, b1, ln_g, ln_b, w2, b2, *, tm=512, tn=512, out_dtype=None):
    """x: [N, d_input] -> logits [N, d_output]."""
    N, d_in = x.shape
    d_hidden = w1.shape[1]
    d_out = w2.shape[1]
    out_dtype = x.dtype if out_dtype is None else out_dtype

    b1 = b1.reshape(1, d_hidden).astype(jnp.float32)
    ln_g = ln_g.reshape(d_hidden, 1).astype(jnp.float32)
    ln_b = ln_b.reshape(1, d_hidden).astype(jnp.float32)
    b2 = b2.reshape(1, d_out).astype(jnp.float32)

    # Fold the LayerNorm affine into Linear2 (f32 math in the wrapper):
    #   (z * g + beta) @ W2 + b2  ==  z @ (g[:, None] * W2) + (beta @ W2 + b2)
    # (gamma rides at bf16 precision inside W2'; acceptable at the test tolerance.)
    w2_f = (ln_g * w2.astype(jnp.float32)).astype(jnp.bfloat16)   # [d_hidden, d_out]
    b2_f = ln_b @ w2.astype(jnp.float32) + b2                     # [1, d_out] f32

    w1_b = w1.astype(jnp.bfloat16)

    # ---- Row tiling: balanced tiles + partial-last-block handling (no row padding). ----
    n_row_tiles = _cdiv(N, tm)
    tm_eff = _round_up(_cdiv(N, n_row_tiles), 16)
    grid_m = _cdiv(N, tm_eff)

    # ---- Column tiling over d_output. Small heads: single full-width (lane-exact) tile;
    #      large heads: 128-multiple tiles so W2' is never fully resident. ----
    if d_out <= tn:
        tn_eff = d_out
    else:
        tn_eff = _round_up(tn, 128)
    grid_n = _cdiv(d_out, tn_eff)

    cost = pl.CostEstimate(
        flops=2 * N * (d_in * d_hidden + d_hidden * d_out),
        transcendentals=N * d_hidden,
        bytes_accessed=(x.size * x.dtype.itemsize
                        + w1_b.size * 2 + b1.size * 4
                        + grid_m * (w2_f.size * 2 + b2_f.size * 4)
                        + N * d_out * jnp.dtype(out_dtype).itemsize),
    )

    out = pl.pallas_call(
        _projector_mlp_kernel,
        out_shape=jax.ShapeDtypeStruct((N, d_out), out_dtype),
        grid_spec=pltpu.PrefetchScalarGridSpec(
            num_scalar_prefetch=0,
            grid=(grid_m, grid_n),
            in_specs=[
                pl.BlockSpec((tm_eff, d_in), lambda i, j: (i, 0)),      # x row tile
                pl.BlockSpec((d_in, d_hidden), lambda i, j: (0, 0)),    # W1 (resident)
                pl.BlockSpec((1, d_hidden), lambda i, j: (0, 0)),       # b1
                pl.BlockSpec((d_hidden, tn_eff), lambda i, j: (0, j)),  # W2' column tile
                pl.BlockSpec((1, tn_eff), lambda i, j: (0, j)),         # b2' column tile
            ],
            out_specs=pl.BlockSpec((tm_eff, tn_eff), lambda i, j: (i, j)),
            scratch_shapes=[pltpu.VMEM((tm_eff, d_hidden), jnp.bfloat16)],  # z (per row tile)
        ),
        compiler_params=pltpu.CompilerParams(
            # Column axis must be "arbitrary": the z scratch computed at j == 0 is reused
            # by later column tiles on the same core.
            dimension_semantics=("parallel", "arbitrary")),
        cost_estimate=cost,
    )(x, w1_b, b1, w2_f, b2_f)

    return out


def reference_mlp(x, w1, b1, ln_g, ln_b, w2, b2):
    h = jnp.tanh(x @ w1 + b1)
    mean = jnp.mean(h, axis=-1, keepdims=True)
    var = jnp.mean((h - mean) ** 2, axis=-1, keepdims=True)
    z = (h - mean) / jnp.sqrt(var + LN_EPS) * ln_g + ln_b
    return z @ w2 + b2


if __name__ == "__main__":
    # Small shapes consistent with the module (projection_type='mlp', d_hidden=512 default).
    # N deliberately not a multiple of the tile to exercise partial-last-block handling.
    N, d_input, d_hidden, d_output = 50, 48, 512, 8

    key = jax.random.PRNGKey(0)
    k_x, k_w1, k_b1, k_g, k_b, k_w2, k_b2 = jax.random.split(key, 7)

    x = jax.random.normal(k_x, (N, d_input), dtype=jnp.float32)

    # Deterministic parameter init (mimics nn.Linear uniform init ranges).
    lim1 = 1.0 / (d_input ** 0.5)
    w1 = jax.random.uniform(k_w1, (d_input, d_hidden), jnp.float32, -lim1, lim1)
    b1 = jax.random.uniform(k_b1, (d_hidden,), jnp.float32, -lim1, lim1)
    # Non-trivial LayerNorm affine so the wrapper-side folding is actually exercised.
    ln_g = 1.0 + 0.1 * jax.random.normal(k_g, (d_hidden,), jnp.float32)
    ln_b = 0.1 * jax.random.normal(k_b, (d_hidden,), jnp.float32)
    lim2 = 1.0 / (d_hidden ** 0.5)
    w2 = jax.random.uniform(k_w2, (d_hidden, d_output), jnp.float32, -lim2, lim2)
    b2 = jax.random.uniform(k_b2, (d_output,), jnp.float32, -lim2, lim2)

    out = projector_mlp(x, w1, b1, ln_g, ln_b, w2, b2, tm=512, tn=512)
    out = jax.block_until_ready(out)

    ref = reference_mlp(x, w1, b1, ln_g, ln_b, w2, b2)
    assert out.shape == (N, d_output), out.shape
    max_err = float(jnp.max(jnp.abs(out - ref)))
    # Tolerance loosened for bf16 matmul operands (f32 accumulation).
    assert jnp.allclose(out, ref, atol=5e-2, rtol=5e-2), (
        f"mismatch vs reference: max abs err {max_err}")

    print("KERNEL_OK")
</pallas_src>

<mosaic_0001>
module attributes {stable_mosaic.version = 11 : i64} {
  func.func @_projector_mlp_kernel(%arg0: i32, %arg1: i32, %arg2: memref<64x48xf32, #tpu.memory_space<vmem>>, %arg3: memref<48x512xbf16, #tpu.memory_space<vmem>>, %arg4: memref<1x512xf32, #tpu.memory_space<vmem>>, %arg5: memref<512x8xbf16, #tpu.memory_space<vmem>>, %arg6: memref<1x8xf32, #tpu.memory_space<vmem>>, %arg7: memref<64x8xf32, #tpu.memory_space<vmem>>, %arg8: memref<64x512xbf16, #tpu.memory_space<vmem>>) attributes {dimension_semantics = [#tpu.dimension_semantics<parallel>, #tpu.dimension_semantics<arbitrary>], iteration_bounds = array<i64: 1, 1>, scalar_prefetch = 0 : i64, scratch_operands = 1 : i64, tpu.core_type = #tpu.core_type<tc>, window_params = [{transform_indices = @transform_0, window_bounds = array<i64: 64, 48>}, {pipeline_mode = #tpu.pipeline_mode<synchronous>, transform_indices = @transform_1, window_bounds = array<i64: 48, 512>}, {pipeline_mode = #tpu.pipeline_mode<synchronous>, transform_indices = @transform_2, window_bounds = array<i64: 1, 512>}, {transform_indices = @transform_3, window_bounds = array<i64: 512, 8>}, {transform_indices = @transform_4, window_bounds = array<i64: 1, 8>}, {transform_indices = @transform_5, window_bounds = array<i64: 64, 8>}]} {
    %c0_i32 = arith.constant 0 : i32
    %0 = arith.cmpi eq, %arg1, %c0_i32 : i32
    %1 = arith.extui %0 : i1 to i32
    %c0_i32_0 = arith.constant 0 : i32
    %2 = arith.cmpi ne, %1, %c0_i32_0 : i32
    scf.if %2 {
      %c0_8 = arith.constant 0 : index
      %c0_9 = arith.constant 0 : index
      %10 = vector.load %arg2[%c0_8, %c0_9] : memref<64x48xf32, #tpu.memory_space<vmem>>, vector<64x48xf32>
      %11 = arith.truncf %10 : vector<64x48xf32> to vector<64x48xbf16>
      %c0_10 = arith.constant 0 : index
      %c0_11 = arith.constant 0 : index
      %12 = vector.load %arg3[%c0_10, %c0_11] : memref<48x512xbf16, #tpu.memory_space<vmem>>, vector<48x512xbf16>
      %cst_12 = arith.constant dense<0.000000e+00> : vector<64x512xf32>
      %13 = tpu.matmul %11, %12, %cst_12 {dimension_numbers = #tpu.dot_dimension_numbers<[1], [0], [0], [1], [0, 0, 1, 1], [], []>} : vector<64x48xbf16>, vector<48x512xbf16>, vector<64x512xf32> -> vector<64x512xf32>
      %c0_13 = arith.constant 0 : index
      %c0_14 = arith.constant 0 : index
      %14 = vector.load %arg4[%c0_13, %c0_14] : memref<1x512xf32, #tpu.memory_space<vmem>>, vector<1x512xf32>
      %15 = vector.broadcast %14 : vector<1x512xf32> to vector<64x512xf32>
      %16 = arith.addf %13, %15 : vector<64x512xf32>
      %17 = math.tanh %16 : vector<64x512xf32>
      %cst_15 = arith.constant dense<0.000000e+00> : vector<64xf32>
      %18 = vector.multi_reduction <add>, %17, %cst_15 [1] : vector<64x512xf32> to vector<64xf32>
      %19 = vector.shape_cast %18 : vector<64xf32> to vector<64x1xf32>
      %cst_16 = arith.constant 5.120000e+02 : f32
      %20 = vector.broadcast %cst_16 : f32 to vector<64x1xf32>
      %21 = arith.divf %19, %20 : vector<64x1xf32>
      %22 = arith.mulf %17, %17 : vector<64x512xf32>
      %cst_17 = arith.constant dense<0.000000e+00> : vector<64xf32>
      %23 = vector.multi_reduction <add>, %22, %cst_17 [1] : vector<64x512xf32> to vector<64xf32>
      %24 = vector.shape_cast %23 : vector<64xf32> to vector<64x1xf32>
      %cst_18 = arith.constant 5.120000e+02 : f32
      %25 = vector.broadcast %cst_18 : f32 to vector<64x1xf32>
      %26 = arith.divf %24, %25 : vector<64x1xf32>
      %27 = arith.mulf %21, %21 : vector<64x1xf32>
      %28 = arith.subf %26, %27 : vector<64x1xf32>
      %cst_19 = arith.constant 9.99999974E-6 : f32
      %29 = vector.broadcast %cst_19 : f32 to vector<64x1xf32>
      %30 = arith.addf %28, %29 : vector<64x1xf32>
      %31 = math.rsqrt %30 : vector<64x1xf32>
      %32 = vector.broadcast %21 : vector<64x1xf32> to vector<64x512xf32>
      %33 = arith.subf %17, %32 : vector<64x512xf32>
      %34 = vector.broadcast %31 : vector<64x1xf32> to vector<64x512xf32>
      %35 = arith.mulf %33, %34 : vector<64x512xf32>
      %36 = arith.truncf %35 : vector<64x512xf32> to vector<64x512xbf16>
      %c0_20 = arith.constant 0 : index
      %c0_21 = arith.constant 0 : index
      %37 = vector.load %arg8[%c0_20, %c0_21] : memref<64x512xbf16, #tpu.memory_space<vmem>>, vector<64x512xbf16>
      tpu.vector_store %arg8[%c0_20, %c0_21], %36 {strides = array<i32>} : memref<64x512xbf16, #tpu.memory_space<vmem>>, vector<64x512xbf16>,
    } else {
    }
    %c0 = arith.constant 0 : index
    %c0_1 = arith.constant 0 : index
    %3 = vector.load %arg8[%c0, %c0_1] : memref<64x512xbf16, #tpu.memory_space<vmem>>, vector<64x512xbf16>
    %c0_2 = arith.constant 0 : index
    %c0_3 = arith.constant 0 : index
    %4 = vector.load %arg5[%c0_2, %c0_3] : memref<512x8xbf16, #tpu.memory_space<vmem>>, vector<512x8xbf16>
    %cst = arith.constant dense<0.000000e+00> : vector<64x8xf32>
    %5 = tpu.matmul %3, %4, %cst {dimension_numbers = #tpu.dot_dimension_numbers<[1], [0], [0], [1], [0, 0, 1, 1], [], []>} : vector<64x512xbf16>, vector<512x8xbf16>, vector<64x8xf32> -> vector<64x8xf32>
    %c0_4 = arith.constant 0 : index
    %c0_5 = arith.constant 0 : index
    %6 = vector.load %arg6[%c0_4, %c0_5] : memref<1x8xf32, #tpu.memory_space<vmem>>, vector<1x8xf32>
    %7 = vector.broadcast %6 : vector<1x8xf32> to vector<64x8xf32>
    %8 = arith.addf %5, %7 : vector<64x8xf32>
    %c0_6 = arith.constant 0 : index
    %c0_7 = arith.constant 0 : index
    %9 = vector.load %arg7[%c0_6, %c0_7] : memref<64x8xf32, #tpu.memory_space<vmem>>, vector<64x8xf32>
    tpu.vector_store %arg7[%c0_6, %c0_7], %8 {strides = array<i32>} : memref<64x8xf32, #tpu.memory_space<vmem>>, vector<64x8xf32>,
    return
  }
  func.func @transform_0(%arg0: i32, %arg1: i32) -> (i32, i32) {
    %c0_i32 = arith.constant 0 : i32
    %c0_i32_0 = arith.constant 0 : i32
    return %arg0, %c0_i32 : i32, i32
  }
  func.func @transform_1(%arg0: i32, %arg1: i32) -> (i32, i32) {
    %c0_i32 = arith.constant 0 : i32
    %c0_i32_0 = arith.constant 0 : i32
    %c0_i32_1 = arith.constant 0 : i32
    return %c0_i32, %c0_i32_0 : i32, i32
  }
  func.func @transform_2(%arg0: i32, %arg1: i32) -> (i32, i32) {
    %c0_i32 = arith.constant 0 : i32
    %c0_i32_0 = arith.constant 0 : i32
    %c0_i32_1 = arith.constant 0 : i32
    return %c0_i32, %c0_i32_0 : i32, i32
  }
  func.func @transform_3(%arg0: i32, %arg1: i32) -> (i32, i32) {
    %c0_i32 = arith.constant 0 : i32
    %c0_i32_0 = arith.constant 0 : i32
    return %c0_i32, %arg1 : i32, i32
  }
  func.func @transform_4(%arg0: i32, %arg1: i32) -> (i32, i32) {
    %c0_i32 = arith.constant 0 : i32
    %c0_i32_0 = arith.constant 0 : i32
    return %c0_i32, %arg1 : i32, i32
  }
  func.func @transform_5(%arg0: i32, %arg1: i32) -> (i32, i32) {
    %c0_i32 = arith.constant 0 : i32
    return %arg0, %arg1 : i32, i32
  }
}

</mosaic_0001>

<bundles_post_ra>
// kernel: projector_mlp.1
= control target key start
LH: loop header
LB: loop body
LE: loop exit
PB: predicated region body
PF: predicated region fallthrough
CT: control target
= control target key end

     0   :  { %v1550_v2 = vmov 0   ;;  %vm131_vm0 = vcmask 392192   ;;  %v51_v27 = vlaneseq  ;;  %vm1148_vm1 = vcmask 64512   ;;  %s2068_s0 = inlined_call_operand.vmem [shape: f32[50,48], index: 0, kind: input, shape index: {}]   ;;  %s2069_s1 = inlined_call_operand.vmem [shape: bf16[48,512], index: 1, kind: input, shape index: {}]   ;;  %s2070_s2 = inlined_call_operand.vmem [shape: f32[1,512], index: 2, kind: input, shape index: {}]   ;;  %s2071_s3 = inlined_call_operand.vmem [shape: bf16[512,8], index: 3, kind: input, shape index: {}]   ;;  %s2072_s4 = inlined_call_operand.vmem [shape: f32[1,8], index: 4, kind: input, shape index: {}]   ;;  %s2073_s5 = inlined_call_operand.vmem [shape: f32[50,8], index: 5, kind: output, shape index: {}]  }
   0x1   :  { %v1420_v0 = vld [vmem:[%s2069_s1 + $0x44] ss:$16 sps:$4 sm:$0xff]   ;;  %v1422_v1 = vld [vmem:[%s2069_s1 + $0x4c] ss:$16 sps:$4 sm:$0xff]   ;;  %176 = vmatprep.mubr.bf16.mxu0 %v1550_v2  ;;  %249 = vmatprep.mubr.bf16.mxu1 %v1550_v2  ;;  %v1424_v3 = vld [vmem:[%s2069_s1 + $0x40] ss:$16 sps:$4 sm:$0xff]  }
   0x2   :  { %154 = vmatprep.subr.bf16.mxu0 %v1420_v0  ;;  %v1425_v4 = vld [vmem:[%s2069_s1 + $0x48] ss:$16 sps:$4 sm:$0xff]   ;;  %227 = vmatprep.subr.bf16.mxu1 %v1422_v1  ;;  %v1426_v5 = vld [vmem:[%s2069_s1 + $0x24] ss:$16 sps:$4 sm:$0xff]   ;;  %v1428_v6 = vld [vmem:[%s2069_s1 + $0x2c] ss:$16 sps:$4 sm:$0xff]  }
   0x3   :  { %155 = vmatpush1.bf16.msra.mxu0 %v1424_v3  ;;  %228 = vmatpush1.bf16.msra.mxu1 %v1425_v4  ;;  %v1430_v7 = vld [vmem:[%s2069_s1 + $0x20] ss:$16 sps:$4 sm:$0xff]   ;;  %v1431_v8 = vld [vmem:[%s2069_s1 + $0x28] ss:$16 sps:$4 sm:$0xff]   ;;  %v1432_v9 = vld [vmem:[%s2069_s1 + $0x4] ss:$16 sps:$4 sm:$0xff]  }
   0x4   :  { %156 = vmatprep.subr.bf16.mxu0 %v1426_v5  ;;  %229 = vmatprep.subr.bf16.mxu1 %v1428_v6  ;;  %v1434_v10 = vld [vmem:[%s2069_s1 + $0xc] ss:$16 sps:$4 sm:$0xff]   ;;  %v1436_v11 = vld [vmem:[%s2069_s1] ss:$16 sps:$4 sm:$0xff]   ;;  %v1437_v12 = vld [vmem:[%s2069_s1 + $0x8] ss:$16 sps:$4 sm:$0xff]  }
   0x5   :  { %v25_v13 = vld [vmem:[%s2068_s0] sm:$0xff]  ;;  %v26_v14 = vld [vmem:[%s2068_s0 + $0x8] sm:$0xff]  ;;  %v27_v16 = vld [vmem:[%s2068_s0 + $0x10] sm:$0xff]  ;;  %v52_v28 = vshrl.u32 %v51_v27, 7 }
   0x6   :  { %v33_v15 = vpack.c.bf16 %v26_v14, %v25_v13  ;;  %v28_v17 = vld [vmem:[%s2068_s0 + $0x18] sm:$0xff]  ;;  %v29_v19 = vld [vmem:[%s2068_s0 + $0x20] sm:$0xff]  ;;  %v30_v20 = vld [vmem:[%s2068_s0 + $0x28] sm:$0xff] }
   0x7   :  { %157 = vmatpush1.bf16.msra.mxu0 %v1430_v7  ;;  %230 = vmatpush1.bf16.msra.mxu1 %v1431_v8  ;;  %v34_v18 = vpack.c.bf16 %v28_v17, %v27_v16  ;;  %v35_v21 = vpack.c.bf16 %v30_v20, %v29_v19  ;;  %v31_v22 = vld [vmem:[%s2068_s0 + $0x30] sm:$0xff]  ;;  %v32_v23 = vld [vmem:[%s2068_s0 + $0x38] sm:$0xff]  ;;  %v53_v29 = vsub.s32 0, %v52_v28  ;;  %v61_v30 = vsub.s32 2, %v52_v28  ;;  %v49_v31 = vld [vmem:[%s2070_s2] sm:$0xf] }
   0x8   :  { %158 = vmatprep.subr.bf16.mxu0 %v1432_v9  ;;  %231 = vmatprep.subr.bf16.mxu1 %v1434_v10  ;;  %v36_v24 = vpack.c.bf16 %v32_v23, %v31_v22  ;;  %v1438_v25 = vld [vmem:[%s2071_s3 + $0x78] sm:$0xff]   ;;  %v57_v32 = vsub.s32 1, %v52_v28  ;;  %v65_v33 = vsub.s32 3, %v52_v28 }
   0x9   :  { %v1439_v26 = vld [vmem:[%s2071_s3 + $0xf8] sm:$0xff]   ;;  %v1658_v34 = vrot.slane %v49_v31, %v53_v29  ;;  %v1660_v35 = vrot.slane %v49_v31, %v61_v30 }
   0xa   :  { %v1662_v36 = vrot.slane %v49_v31, %v57_v32  ;;  %v1664_v37 = vrot.slane %v49_v31, %v65_v33 }
   0xb   :  { %159 = vmatpush1.bf16.msra.mxu0 %v1436_v11  ;;  %232 = vmatpush1.bf16.msra.mxu1 %v1437_v12 }
   0xc   :  { %1339 = vmatprep.subr.bf16.mxu0 %v1438_v25  ;;  %1379 = vmatprep.subr.bf16.mxu1 %v1439_v26 }
   0xe   :  { %1234 = vmatmul.mubr.msk.bf16.vlgmr.msra.gmra.mxu0 %vm131_vm0, %v33_v15  ;;  %1238 = vmatmul.mubr.msk.bf16.vlgmr.msra.gmra.mxu1 %vm131_vm0, %v33_v15 }
   0xf   :  { %186 = vmatprep.mubr.bf16.mxu0 %v1550_v2  ;;  %259 = vmatprep.mubr.bf16.mxu1 %v1550_v2 }
  0x16   :  { %1235 = vmatmul.mubr.msk.bf16.gmra.mxu0 %vm131_vm0, %v34_v18  ;;  %1239 = vmatmul.mubr.msk.bf16.gmra.mxu1 %vm131_vm0, %v34_v18 }
  0x17   :  { %196 = vmatprep.mubr.bf16.mxu0 %v1550_v2  ;;  %269 = vmatprep.mubr.bf16.mxu1 %v1550_v2 }
  0x1e   :  { %1236 = vmatmul.mubr.msk.bf16.gmra.mxu0 %vm131_vm0, %v35_v21  ;;  %1240 = vmatmul.mubr.msk.bf16.gmra.mxu1 %vm131_vm0, %v35_v21 }
  0x1f   :  { %206 = vmatprep.mubr.bf16.mxu0 %v1550_v2  ;;  %279 = vmatprep.mubr.bf16.mxu1 %v1550_v2 }
  0x26   :  { %1237 = vmatmul.mubr.msk.bf16.gmra.mxu0 %vm131_vm0, %v36_v24  ;;  %1241 = vmatmul.mubr.msk.bf16.gmra.mxu1 %vm131_vm0, %v36_v24 }
  0xce   :  { %v178_v38 = vpop.f32.mrf.mxu0  ;;  %v251_v39 = vpop.f32.mrf.mxu1 }
  0xcf   :  { %v179_v40 = vadd.f32 %v178_v38, %v1658_v34  ;;  %v252_v41 = vadd.f32 %v251_v39, %v1660_v35 }
  0xd0   :  { %v180_v42 = vpop.f32.mrf.mxu0  ;;  %v253_v43 = vpop.f32.mrf.mxu1 }
  0xd1   :  { %1470 = vtanh.f32 %v179_v40  ;;  %v181_v44 = vadd.f32 %v180_v42, %v1662_v36  ;;  %v254_v45 = vadd.f32 %v253_v43, %v1664_v37 }
  0xd2   :  { %1472 = vtanh.f32 %v252_v41  ;;  %v182_v46 = vpop.f32.mrf.mxu0  ;;  %v255_v47 = vpop.f32.mrf.mxu1 }
  0xd3   :  { %1474 = vtanh.f32 %v181_v44  ;;  %v183_v48 = vadd.f32 %v182_v46, %v1658_v34  ;;  %v256_v49 = vadd.f32 %v255_v47, %v1660_v35 }
  0xd4   :  { %1476 = vtanh.f32 %v254_v45  ;;  %v184_v50 = vpop.f32.mrf.mxu0  ;;  %v257_v51 = vpop.f32.mrf.mxu1 }
  0xd5   :  { %1478 = vtanh.f32 %v183_v48  ;;  %v185_v52 = vadd.f32 %v184_v50, %v1662_v36  ;;  %v258_v53 = vadd.f32 %v257_v51, %v1664_v37 }
  0xd6   :  { %1480 = vtanh.f32 %v256_v49  ;;  %v188_v54 = vpop.f32.mrf.mxu0  ;;  %v261_v55 = vpop.f32.mrf.mxu1 }
  0xd7   :  { %1482 = vtanh.f32 %v185_v52  ;;  %v189_v56 = vadd.f32 %v188_v54, %v1658_v34  ;;  %v262_v57 = vadd.f32 %v261_v55, %v1660_v35 }
  0xd8   :  { %1484 = vtanh.f32 %v258_v53  ;;  %v190_v58 = vpop.f32.mrf.mxu0  ;;  %v263_v59 = vpop.f32.mrf.mxu1 }
  0xd9   :  { %1486 = vtanh.f32 %v189_v56  ;;  %v191_v60 = vadd.f32 %v190_v58, %v1662_v36  ;;  %v264_v61 = vadd.f32 %v263_v59, %v1664_v37 }
  0xda   :  { %1488 = vtanh.f32 %v262_v57  ;;  %v192_v62 = vpop.f32.mrf.mxu0  ;;  %v265_v63 = vpop.f32.mrf.mxu1 }
  0xdb   :  { %1490 = vtanh.f32 %v191_v60  ;;  %v193_v0 = vadd.f32 %v192_v62, %v1658_v34  ;;  %v266_v1 = vadd.f32 %v265_v63, %v1660_v35 }
  0xdc   :  { %1492 = vtanh.f32 %v264_v61  ;;  %v194_v2 = vpop.f32.mrf.mxu0  ;;  %v267_v3 = vpop.f32.mrf.mxu1 }
  0xdd   :  { %1494 = vtanh.f32 %v193_v0  ;;  %v195_v4 = vadd.f32 %v194_v2, %v1662_v36  ;;  %v268_v5 = vadd.f32 %v267_v3, %v1664_v37 }
  0xde   :  { %v1682_v6 = vpop.eup %1470  ;;  %1496 = vtanh.f32 %v266_v1  ;;  %v198_v7 = vpop.f32.mrf.mxu0 }
  0xdf   :  { %v271_v8 = vpop.f32.mrf.mxu1  ;;  %v1684_v9 = vpop.eup %1472  ;;  %1498 = vtanh.f32 %v195_v4  ;;  %v199_v10 = vadd.f32 %v198_v7, %v1658_v34  ;;  %v371_v15 = vmul.f32 %v1682_v6, %v1682_v6 }
  0xe0   :  { %v272_v11 = vadd.f32 %v271_v8, %v1660_v35  ;;  %v1688_v12 = vpop.eup %1474  ;;  %1500 = vtanh.f32 %v268_v5  ;;  %v200_v13 = vpop.f32.mrf.mxu0  ;;  %v373_v24 = vmul.f32 %v1684_v9, %v1684_v9 }
  0xe1   :  { %v273_v14 = vpop.f32.mrf.mxu1  ;;  %v1692_v16 = vpop.eup %1476  ;;  %1502 = vtanh.f32 %v199_v10  ;;  %v201_v17 = vadd.f32 %v200_v13, %v1662_v36  ;;  %v322_v19 = vadd.f32 %v1688_v12, %v1682_v6  ;;  %v372_v23 = vmul.f32 %v1688_v12, %v1688_v12 }
  0xe2   :  { %v274_v18 = vadd.f32 %v273_v14, %v1664_v37  ;;  %v1698_v20 = vpop.eup %1478  ;;  %1504 = vtanh.f32 %v272_v11  ;;  %v202_v21 = vpop.f32.mrf.mxu0  ;;  %v374_v25 = vmul.f32 %v1692_v16, %v1692_v16 }
  0xe3   :  { %v275_v22 = vpop.f32.mrf.mxu1  ;;  %v1706_v26 = vpop.eup %1480  ;;  %1506 = vtanh.f32 %v201_v17  ;;  %v203_v27 = vadd.f32 %v202_v21, %v1658_v34  ;;  %v323_v29 = vadd.f32 %v1684_v9, %v322_v19  ;;  %v403_v33 = vadd.f32 %v372_v23, %v371_v15 }
  0xe4   :  { %v276_v28 = vadd.f32 %v275_v22, %v1660_v35  ;;  %v1711_v30 = vpop.eup %1482  ;;  %1508 = vtanh.f32 %v274_v18  ;;  %v204_v31 = vpop.f32.mrf.mxu0  ;;  %v375_v38 = vmul.f32 %v1698_v20, %v1698_v20  ;;  %v377_v39 = vmul.f32 %v1706_v26, %v1706_v26 }
  0xe5   :  { %v277_v32 = vpop.f32.mrf.mxu1  ;;  %v1717_v40 = vpop.eup %1484  ;;  %1510 = vtanh.f32 %v203_v27  ;;  %v205_v41 = vadd.f32 %v204_v31, %v1662_v36  ;;  %v324_v43 = vadd.f32 %v1692_v16, %v323_v29  ;;  %v404_v47 = vadd.f32 %v403_v33, %v373_v24 }
  0xe6   :  { %v278_v42 = vadd.f32 %v277_v32, %v1664_v37  ;;  %v1722_v44 = vpop.eup %1486  ;;  %1512 = vtanh.f32 %v276_v28  ;;  %v208_v45 = vpop.f32.mrf.mxu0  ;;  %v327_v48 = vadd.f32 %v1711_v30, %v1698_v20  ;;  %v376_v49 = vmul.f32 %v1711_v30, %v1711_v30 }
  0xe7   :  { %v281_v46 = vpop.f32.mrf.mxu1  ;;  %v1728_v50 = vpop.eup %1488  ;;  %1514 = vtanh.f32 %v205_v41  ;;  %v209_v51 = vadd.f32 %v208_v45, %v1658_v34  ;;  %325 = vadd.xlane.f32.xlu0 %v324_v43  ;;  %v378_v53 = vmul.f32 %v1717_v40, %v1717_v40  ;;  %v405_v57 = vadd.f32 %v404_v47, %v374_v25 }
  0xe8   :  { %v282_v52 = vadd.f32 %v281_v46, %v1660_v35  ;;  %v1734_v54 = vpop.eup %1490  ;;  %1516 = vtanh.f32 %v278_v42  ;;  %v210_v55 = vpop.f32.mrf.mxu0  ;;  %v328_v58 = vadd.f32 %v1706_v26, %v327_v48  ;;  %v408_v59 = vadd.f32 %v376_v49, %v375_v38 }
  0xe9   :  { %v283_v56 = vpop.f32.mrf.mxu1  ;;  %v1737_v60 = vpop.eup %1492  ;;  %1518 = vtanh.f32 %v209_v51  ;;  %v211_v61 = vadd.f32 %v210_v55, %v1662_v36  ;;  %v332_v63 = vadd.f32 %v1734_v54, %v1722_v44  ;;  %406 = vadd.xlane.f32.xlu1 %v405_v57  ;;  %v379_v5 = vmul.f32 %v1722_v44, %v1722_v44  ;;  %v1440_v55 = vld [vmem:[%s2071_s3 + $0x38] sm:$0xff]  }
  0xea   :  { %v284_v62 = vadd.f32 %v283_v56, %v1664_v37  ;;  %v1743_v0 = vpop.eup %1494  ;;  %1520 = vtanh.f32 %v282_v52  ;;  %v212_v1 = vpop.f32.mrf.mxu0  ;;  %v329_v3 = vadd.f32 %v1717_v40, %v328_v58  ;;  %v409_v4 = vadd.f32 %v408_v59, %v377_v39  ;;  %v1441_v56 = vld [vmem:[%s2071_s3 + $0xb8] sm:$0xff]   ;;  %1340 = vmatpush3.bf16.msra.mxu0 %v1440_v55 }
  0xeb   :  { %v285_v2 = vpop.f32.mrf.mxu1  ;;  %v1748_v7 = vpop.eup %1496  ;;  %1522 = vtanh.f32 %v211_v61  ;;  %v213_v8 = vadd.f32 %v212_v1, %v1658_v34  ;;  %v333_v11 = vadd.f32 %v1728_v50, %v332_v63  ;;  %v380_v18 = vmul.f32 %v1734_v54, %v1734_v54  ;;  %1380 = vmatpush3.bf16.msra.mxu1 %v1441_v56 }
  0xec   :  { %v286_v10 = vadd.f32 %v285_v2, %v1660_v35  ;;  %v1753_v13 = vpop.eup %1498  ;;  %1524 = vtanh.f32 %v284_v62  ;;  %330 = vadd.xlane.f32.xlu0 %v329_v3  ;;  %v214_v14 = vpop.f32.mrf.mxu0  ;;  %v410_v17 = vadd.f32 %v409_v4, %v378_v53  ;;  %v381_v19 = vmul.f32 %v1728_v50, %v1728_v50 }
  0xed   :  { %v287_v15 = vpop.f32.mrf.mxu1  ;;  %v1759_v21 = vpop.eup %1500  ;;  %1526 = vtanh.f32 %v213_v8  ;;  %v215_v34 = vadd.f32 %v214_v14, %v1662_v36  ;;  %v334_v35 = vadd.f32 %v1737_v60, %v333_v11  ;;  %v337_v23 = vadd.f32 %v1753_v13, %v1743_v0  ;;  %v1443_v8 = vld [vmem:[%s2071_s3 + $0xf0] sm:$0xff]  }
  0xee   :  { %v1763_v22 = vpop.eup %1502  ;;  %1528 = vtanh.f32 %v286_v10  ;;  %411 = vadd.xlane.f32.xlu1 %v410_v17  ;;  %v413_v24 = vadd.f32 %v380_v18, %v379_v5  ;;  %v288_v27 = vadd.f32 %v287_v15, %v1664_v37  ;;  %v383_v28 = vmul.f32 %v1743_v0, %v1743_v0  ;;  %v1442_v5 = vld [vmem:[%s2071_s3 + $0x70] sm:$0xff]   ;;  %1381 = vmatprep.subr.bf16.mxu1 %v1443_v8 }
  0xef   :  { %v1767_v25 = vpop.eup %1504  ;;  %1530 = vtanh.f32 %v215_v34  ;;  %v384_v36 = vmul.f32 %v1753_v13, %v1753_v13  ;;  %v338_v31 = vadd.f32 %v1748_v7, %v337_v23  ;;  %v382_v32 = vmul.f32 %v1737_v60, %v1737_v60  ;;  %v1444_v15 = vld [vmem:[%s2071_s3 + $0x30] sm:$0xff]   ;;  %1341 = vmatprep.subr.bf16.mxu0 %v1442_v5  ;;  %v1453_v5 = vld [vmem:[%s2071_s3 + $0xa0] sm:$0xff]  }
  0xf0   :  { %v1774_v29 = vpop.eup %1506  ;;  %335 = vadd.xlane.f32.xlu0 %v334_v35  ;;  %v414_v33 = vadd.f32 %v413_v24, %v381_v19  ;;  %v385_v38 = vmul.f32 %v1748_v7, %v1748_v7  ;;  %v387_v42 = vmul.f32 %v1763_v22, %v1763_v22  ;;  %v389_v48 = vmul.f32 %v1767_v25, %v1767_v25  ;;  %v1445_v17 = vld [vmem:[%s2071_s3 + $0xb0] sm:$0xff]  }
  0xf1   :  { %v1781_v39 = vpop.eup %1508  ;;  %v418_v37 = vadd.f32 %v384_v36, %v383_v28  ;;  %v342_v41 = vadd.f32 %v1774_v29, %v1763_v22  ;;  %v388_v43 = vmul.f32 %v1774_v29, %v1774_v29  ;;  %v339_v46 = vadd.f32 %v1759_v21, %v338_v31  ;;  %1342 = vmatpush3.bf16.msra.mxu0 %v1444_v15 }
  0xf2   :  { %v1789_v45 = vpop.eup %1510  ;;  %v415_v47 = vadd.f32 %v414_v33, %v382_v32  ;;  %1532 = vtanh.f32 %v288_v27  ;;  %v386_v58 = vmul.f32 %v1759_v21, %v1759_v21  ;;  %v390_v14 = vmul.f32 %v1781_v39, %v1781_v39  ;;  %1382 = vmatpush3.bf16.msra.mxu1 %v1445_v17 }
  0xf3   :  { %v1794_v49 = vpop.eup %1512  ;;  %v419_v51 = vadd.f32 %v418_v37, %v385_v38  ;;  %v343_v52 = vadd.f32 %v1767_v25, %v342_v41  ;;  %v423_v53 = vadd.f32 %v388_v43, %v387_v42  ;;  %340 = vadd.xlane.f32.xlu1 %v339_v46  ;;  %v391_v3 = vmul.f32 %v1789_v45, %v1789_v45  ;;  %v1446_v38 = vld [vmem:[%s2071_s3 + $0x68] sm:$0xff]  }
  0xf4   :  { %v1803_v57 = vpop.eup %1514  ;;  %416 = vadd.xlane.f32.xlu0 %v415_v47  ;;  %v393_v19 = vmul.f32 %v1794_v49, %v1794_v49  ;;  %v1447_v37 = vld [vmem:[%s2071_s3 + $0xe8] sm:$0xff]   ;;  %1343 = vmatprep.subr.bf16.mxu0 %v1446_v38  ;;  %v1460_v38 = vld [vmem:[%s2071_s3 + $0x10] sm:$0xff]  }
  0xf5   :  { %v1807_v59 = vpop.eup %1516  ;;  %v344_v61 = vadd.f32 %v1781_v39, %v343_v52  ;;  %v347_v62 = vadd.f32 %v1803_v57, %v1789_v45  ;;  %v420_v1 = vadd.f32 %v419_v51, %v386_v58  ;;  %v424_v2 = vadd.f32 %v423_v53, %v389_v48  ;;  %v1448_v46 = vld [vmem:[%s2071_s3 + $0x28] sm:$0xff]   ;;  %1383 = vmatprep.subr.bf16.mxu1 %v1447_v37  ;;  %v1461_v37 = vld [vmem:[%s2071_s3 + $0x90] sm:$0xff]  }
  0xf6   :  { %v1812_v63 = vpop.eup %1518  ;;  %v392_v4 = vmul.f32 %v1803_v57, %v1803_v57  ;;  %v1449_v47 = vld [vmem:[%s2071_s3 + $0xa8] sm:$0xff]   ;;  %v394_v51 = vmul.f32 %v1807_v59, %v1807_v59  ;;  %1344 = vmatpush3.bf16.msra.mxu0 %v1448_v46 }
  0xf7   :  { %v1824_v10 = vpop.eup %1520  ;;  %v348_v11 = vadd.f32 %v1794_v49, %v347_v62  ;;  %421 = vadd.xlane.f32.xlu1 %v420_v1  ;;  %v395_v35 = vmul.f32 %v1812_v63, %v1812_v63  ;;  %v425_v31 = vadd.f32 %v424_v2, %v390_v14  ;;  %v1450_v62 = vld [vmem:[%s2071_s3 + $0x60] sm:$0xff]   ;;  %1384 = vmatpush3.bf16.msra.mxu1 %v1449_v47  ;;  %v1464_v46 = vld [vmem:[%s2071_s3 + $0x8] sm:$0xff]  }
  0xf8   :  { %v1835_v18 = vpop.eup %1522  ;;  %345 = vadd.xlane.f32.xlu0 %v344_v61  ;;  %v428_v34 = vadd.f32 %v392_v4, %v391_v3  ;;  %v397_v33 = vmul.f32 %v1824_v10, %v1824_v10  ;;  %v1451_v1 = vld [vmem:[%s2071_s3 + $0xe0] sm:$0xff]   ;;  %1345 = vmatprep.subr.bf16.mxu0 %v1450_v62  ;;  %v1465_v47 = vld [vmem:[%s2071_s3 + $0x88] sm:$0xff]  }
  0xf9   :  { %v1841_v23 = vpop.eup %1524  ;;  %v349_v24 = vadd.f32 %v1807_v59, %v348_v11  ;;  %v352_v27 = vadd.f32 %v1835_v18, %v1812_v63  ;;  %v396_v28 = vmul.f32 %v1835_v18, %v1835_v18  ;;  %v1452_v4 = vld [vmem:[%s2071_s3 + $0x20] sm:$0xff]   ;;  %1385 = vmatprep.subr.bf16.mxu1 %v1451_v1 }
  0xfa   :  { %v1848_v36 = vpop.eup %1526  ;;  %v429_v32 = vadd.f32 %v428_v34, %v393_v19  ;;  %v398_v11 = vmul.f32 %v1841_v23, %v1841_v23  ;;  %1346 = vmatpush3.bf16.msra.mxu0 %v1452_v4  ;;  %v1454_v34 = vld [vmem:[%s2071_s3 + $0x58] sm:$0xff]  }
  0xfb   :  { %v1858_v41 = vpop.eup %1528  ;;  %v353_v42 = vadd.f32 %v1824_v10, %v352_v27  ;;  %v433_v43 = vadd.f32 %v396_v28, %v395_v35  ;;  %350 = vadd.xlane.f32.xlu1 %v349_v24  ;;  %v399_v55 = vmul.f32 %v1848_v36, %v1848_v36  ;;  %v1455_v35 = vld [vmem:[%s2071_s3 + $0xd8] sm:$0xff]   ;;  %1386 = vmatpush3.bf16.msra.mxu1 %v1453_v5 }
  0xfc   :  { %v1867_v48 = vpop.eup %1530  ;;  %426 = vadd.xlane.f32.xlu0 %v425_v31  ;;  %v430_v58 = vadd.f32 %v429_v32, %v394_v51  ;;  %v401_v14 = vmul.f32 %v1858_v41, %v1858_v41  ;;  %v1456_v24 = vld [vmem:[%s2071_s3 + $0x18] sm:$0xff]   ;;  %1347 = vmatprep.subr.bf16.mxu0 %v1454_v34  ;;  %v1458_v32 = vld [vmem:[%s2071_s3 + $0x50] sm:$0xff]   ;;  %v1466_v51 = vld [vmem:[%s2071_s3 + $0x40] sm:$0xff]  }
  0xfd   :  { %v354_v52 = vadd.f32 %v1841_v23, %v353_v42  ;;  %v357_v53 = vadd.f32 %v1867_v48, %v1848_v36  ;;  %v400_v56 = vmul.f32 %v1867_v48, %v1867_v48  ;;  %v434_v61 = vadd.f32 %v433_v43, %v397_v33  ;;  %v1457_v27 = vld [vmem:[%s2071_s3 + $0x98] sm:$0xff]   ;;  %1387 = vmatprep.subr.bf16.mxu1 %v1455_v35  ;;  %v1459_v33 = vld [vmem:[%s2071_s3 + $0xd0] sm:$0xff]   ;;  %v1462_v42 = vld [vmem:[%s2071_s3 + $0x48] sm:$0xff]  }
  0xfe   :  { %1348 = vmatpush3.bf16.msra.mxu0 %v1456_v24  ;;  %v1463_v43 = vld [vmem:[%s2071_s3 + $0xc8] sm:$0xff]  }
  0xff   :  { %v358_v2 = vadd.f32 %v1858_v41, %v357_v53  ;;  %v438_v3 = vadd.f32 %v400_v56, %v399_v55  ;;  %v1891_v8 = vpop.eup %1532  ;;  %431 = vadd.xlane.f32.xlu1 %v430_v58  ;;  %v435_v17 = vadd.f32 %v434_v61, %v398_v11  ;;  %1388 = vmatpush3.bf16.msra.mxu1 %v1457_v27  ;;  %v1468_v53 = vld [vmem:[%s2071_s3] sm:$0xff]  }
 0x100   :  { %355 = vadd.xlane.f32.xlu0 %v354_v52  ;;  %v402_v28 = vmul.f32 %v1891_v8, %v1891_v8  ;;  %1349 = vmatprep.subr.bf16.mxu0 %v1458_v32  ;;  %v1467_v52 = vld [vmem:[%s2071_s3 + $0xc0] sm:$0xff]  }
 0x101   :  { %v359_v15 = vadd.f32 %v1891_v8, %v358_v2  ;;  %v439_v19 = vadd.f32 %v438_v3, %v401_v14  ;;  %1389 = vmatprep.subr.bf16.mxu1 %v1459_v33  ;;  %v1469_v55 = vld [vmem:[%s2071_s3 + $0x80] sm:$0xff]  }
 0x102   :  { %1350 = vmatpush3.bf16.msra.mxu0 %v1460_v38 }
 0x103   :  { %360 = vadd.xlane.f32.xlu1 %v359_v15  ;;  %v440_v31 = vadd.f32 %v439_v19, %v402_v28  ;;  %1390 = vmatpush3.bf16.msra.mxu1 %v1461_v37 }
 0x104   :  { %436 = vadd.xlane.f32.xlu0 %v435_v17  ;;  %1351 = vmatprep.subr.bf16.mxu0 %v1462_v42 }
 0x105   :  { %1391 = vmatprep.subr.bf16.mxu1 %v1463_v43 }
 0x106   :  { %1352 = vmatpush3.bf16.msra.mxu0 %v1464_v46 }
 0x107   :  { %441 = vadd.xlane.f32.xlu1 %v440_v31  ;;  %1392 = vmatpush3.bf16.msra.mxu1 %v1465_v47 }
 0x108   :  { %1353 = vmatprep.subr.bf16.mxu0 %v1466_v51  ;;  %1393 = vmatprep.subr.bf16.mxu1 %v1467_v52 }
 0x10a   :  { %1354 = vmatpush3.bf16.msra.mxu0 %v1468_v53 }
 0x10b   :  { %1394 = vmatpush3.bf16.msra.mxu1 %v1469_v55 }
 0x170   :  { %v326_v56 = vpop.xlane.xlu0 %325 }
 0x171   :  { %v363_v58 = vmul.f32 0.001953125, %v326_v56 }
 0x172   :  { %v407_v61 = vpop.xlane.xlu1 %406 }
 0x173   :  { %v451_v62 = vmul.f32 %v363_v58, %v363_v58  ;;  %v443_v1 = vmul.f32 0.001953125, %v407_v61 }
 0x175   :  { %v331_v2 = vpop.xlane.xlu0 %330  ;;  %v459_v3 = vsub.f32 %v443_v1, %v451_v62 }
 0x176   :  { %v364_v4 = vmul.f32 0.001953125, %v331_v2  ;;  %v483_v2 = vsub.f32 %v1682_v6, %v363_v58 }
 0x177   :  { %v412_v5 = vpop.xlane.xlu1 %411  ;;  %v467_v11 = vadd.f32 1e-05, %v459_v3  ;;  %v485_v3 = vsub.f32 %v1684_v9, %v363_v58 }
 0x178   :  { %v444_v14 = vmul.f32 0.001953125, %v412_v5  ;;  %v452_v15 = vmul.f32 %v364_v4, %v364_v4  ;;  %v488_v9 = vsub.f32 %v1711_v30, %v364_v4 }
 0x179   :  { %v336_v17 = vpop.xlane.xlu0 %335  ;;  %1534 = vrsqrt.f32 %v467_v11  ;;  %v487_v11 = vsub.f32 %v1698_v20, %v364_v4  ;;  %v490_v20 = vsub.f32 %v1717_v40, %v364_v4 }
 0x17a   :  { %v1948_v19 = vmul.f32 0.001953125, %v336_v17  ;;  %v460_v34 = vsub.f32 %v444_v14, %v452_v15  ;;  %v489_v14 = vsub.f32 %v1706_v26, %v364_v4 }
 0x17c   :  { %v468_v35 = vadd.f32 1e-05, %v460_v34  ;;  %v341_v24 = vpop.xlane.xlu1 %340  ;;  %v453_v31 = vmul.f32 %v1948_v19, %v1948_v19  ;;  %v484_v34 = vsub.f32 %v1688_v12, %v363_v58 }
 0x17d   :  { %v417_v27 = vpop.xlane.xlu0 %416  ;;  %v1950_v28 = vmul.f32 0.001953125, %v341_v24 }
 0x17e   :  { %v445_v32 = vmul.f32 0.001953125, %v417_v27  ;;  %1536 = vrsqrt.f32 %v468_v35  ;;  %v486_v35 = vsub.f32 %v1692_v16, %v363_v58 }
 0x17f   :  { %v454_v43 = vmul.f32 %v1950_v28, %v1950_v28 }
 0x180   :  { %v461_v33 = vsub.f32 %v445_v32, %v453_v31  ;;  %v422_v38 = vpop.xlane.xlu1 %421 }
 0x181   :  { %v346_v37 = vpop.xlane.xlu0 %345  ;;  %v446_v46 = vmul.f32 0.001953125, %v422_v38 }
 0x182   :  { %v469_v42 = vadd.f32 1e-05, %v461_v33  ;;  %v1956_v47 = vmul.f32 0.001953125, %v346_v37 }
 0x183   :  { %v462_v51 = vsub.f32 %v446_v46, %v454_v43 }
 0x184   :  { %1538 = vrsqrt.f32 %v469_v42  ;;  %v351_v52 = vpop.xlane.xlu1 %350  ;;  %v455_v61 = vmul.f32 %v1956_v47, %v1956_v47 }
 0x185   :  { %v427_v53 = vpop.xlane.xlu0 %426  ;;  %v470_v55 = vadd.f32 1e-05, %v462_v51  ;;  %v1958_v56 = vmul.f32 0.001953125, %v351_v52 }
 0x186   :  { %v447_v62 = vmul.f32 0.001953125, %v427_v53  ;;  %v1535_v1 = vpop.eup %1534 }
 0x187   :  { %1540 = vrsqrt.f32 %v470_v55  ;;  %v456_v27 = vmul.f32 %v1958_v56, %v1958_v56  ;;  %v516_v32 = vmul.f32 %v1535_v1, %v484_v34  ;;  %v518_v33 = vmul.f32 %v1535_v1, %v486_v35 }
 0x188   :  { %v463_v5 = vsub.f32 %v447_v62, %v455_v61  ;;  %v432_v15 = vpop.xlane.xlu1 %431  ;;  %v515_v37 = vmul.f32 %v1535_v1, %v483_v2  ;;  %v517_v12 = vmul.f32 %v1535_v1, %v485_v3  ;;  %v494_v34 = vsub.f32 %v1737_v60, %v1948_v19 }
 0x189   :  { %v356_v17 = vpop.xlane.xlu0 %355  ;;  %v448_v31 = vmul.f32 0.001953125, %v432_v15  ;;  %v492_v15 = vsub.f32 %v1734_v54, %v1948_v19  ;;  %v491_v35 = vsub.f32 %v1722_v44, %v1948_v19  ;;  %v497_v54 = vsub.f32 %v1748_v7, %v1950_v28 }
 0x18a   :  { %v471_v24 = vadd.f32 1e-05, %v463_v5  ;;  %v1970_v6 = vmul.f32 0.001953125, %v356_v17  ;;  %v496_v17 = vsub.f32 %v1753_v13, %v1950_v28  ;;  %v500_v7 = vsub.f32 %v1774_v29, %v1956_v47 }
 0x18b   :  { %v1537_v26 = vpop.eup %1536  ;;  %v464_v38 = vsub.f32 %v448_v31, %v456_v27  ;;  %v498_v31 = vsub.f32 %v1759_v21, %v1950_v28  ;;  %v503_v29 = vsub.f32 %v1789_v45, %v1958_v56 }
 0x18c   :  { %1542 = vrsqrt.f32 %v471_v24  ;;  %v361_v42 = vpop.xlane.xlu1 %360  ;;  %v520_v58 = vmul.f32 %v1537_v26, %v488_v9  ;;  %v522_v43 = vmul.f32 %v1537_v26, %v490_v20  ;;  %v519_v46 = vmul.f32 %v1537_v26, %v487_v11 }
 0x18d   :  { %v437_v16 = vpop.xlane.xlu0 %436  ;;  %v521_v51 = vmul.f32 %v1537_v26, %v489_v14  ;;  %v472_v52 = vadd.f32 1e-05, %v464_v38  ;;  %v1974_v53 = vmul.f32 0.001953125, %v361_v42  ;;  %v457_v30 = vmul.f32 %v1970_v6, %v1970_v6 }
 0x18e   :  { %v449_v55 = vmul.f32 0.001953125, %v437_v16  ;;  %v1324_v40 = vpack.c.bf16 %v520_v58, %v516_v32  ;;  %v1326_v4 = vpack.c.bf16 %v522_v43, %v518_v33  ;;  %v1323_v61 = vpack.c.bf16 %v519_v46, %v515_v37 }
 0x18f   :  { %v1325_v62 = vpack.c.bf16 %v521_v51, %v517_v12  ;;  %1544 = vrsqrt.f32 %v472_v52  ;;  %v458_v11 = vmul.f32 %v1974_v53, %v1974_v53  ;;  %v493_v24 = vsub.f32 %v1728_v50, %v1948_v19 }
 0x190   :  { %v465_v2 = vsub.f32 %v449_v55, %v457_v30  ;;  %1050 = vmatprep.mubr.bf16.mxu0 %v1324_v40  ;;  %1115 = vmatprep.mubr.bf16.mxu1 %v1326_v4  ;;  %v442_v1 = vpop.xlane.xlu1 %441  ;;  %v495_v9 = vsub.f32 %v1743_v0, %v1950_v28  ;;  %v502_v28 = vsub.f32 %v1781_v39, %v1956_v47 }
 0x191   :  { %v1539_v3 = vpop.eup %1538  ;;  %v450_v14 = vmul.f32 0.001953125, %v442_v1  ;;  %1051 = vmatmul.mubr.bf16.vlgmr.msra.gmra.mxu0 %v1323_v61  ;;  %1116 = vmatmul.mubr.bf16.vlgmr.msra.gmra.mxu1 %v1325_v62  ;;  %v499_v16 = vsub.f32 %v1763_v22, %v1956_v47  ;;  %v501_v58 = vsub.f32 %v1767_v25, %v1956_v47  ;;  %v504_v43 = vsub.f32 %v1803_v57, %v1958_v56 }
 0x192   :  { %v473_v5 = vadd.f32 1e-05, %v465_v2  ;;  %v524_v32 = vmul.f32 %v1539_v3, %v492_v15  ;;  %v526_v60 = vmul.f32 %v1539_v3, %v494_v34  ;;  %v523_v20 = vmul.f32 %v1539_v3, %v491_v35 }
 0x193   :  { %v466_v27 = vsub.f32 %v450_v14, %v458_v11  ;;  %v525_v50 = vmul.f32 %v1539_v3, %v493_v24  ;;  %v506_v46 = vsub.f32 %v1807_v59, %v1958_v56  ;;  %v505_v51 = vsub.f32 %v1794_v49, %v1958_v56 }
 0x194   :  { %v1541_v13 = vpop.eup %1540  ;;  %1546 = vrsqrt.f32 %v473_v5  ;;  %v508_v45 = vsub.f32 %v1835_v18, %v1970_v6  ;;  %v510_v49 = vsub.f32 %v1841_v23, %v1970_v6  ;;  %v507_v56 = vsub.f32 %v1812_v63, %v1970_v6 }
 0x195   :  { %v474_v33 = vadd.f32 1e-05, %v466_v27  ;;  %v528_v44 = vmul.f32 %v1541_v13, %v496_v17  ;;  %v530_v26 = vmul.f32 %v1541_v13, %v498_v31  ;;  %v527_v38 = vmul.f32 %v1541_v13, %v495_v9 }
 0x196   :  { %v529_v19 = vmul.f32 %v1541_v13, %v497_v54  ;;  %v509_v1 = vsub.f32 %v1824_v10, %v1970_v6  ;;  %v512_v3 = vsub.f32 %v1867_v48, %v1974_v53  ;;  %v514_v5 = vsub.f32 %v1891_v8, %v1974_v53 }
 0x197   :  { %1548 = vrsqrt.f32 %v474_v33  ;;  %v1328_v37 = vpack.c.bf16 %v528_v44, %v524_v32  ;;  %v1330_v21 = vpack.c.bf16 %v530_v26, %v526_v60  ;;  %v1327_v12 = vpack.c.bf16 %v527_v38, %v523_v20 }
 0x198   :  { %v1329_v0 = vpack.c.bf16 %v529_v19, %v525_v50  ;;  %v511_v18 = vsub.f32 %v1848_v36, %v1974_v53  ;;  %v513_v11 = vsub.f32 %v1858_v41, %v1974_v53  ;;  %v2031_v41 = vld [vmem:[%s2072_s4] ss:$0 sm:$0xff] }
 0x199   :  { %v1543_v42 = vpop.eup %1542  ;;  %1058 = vmatprep.mubr.bf16.mxu0 %v1328_v37  ;;  %1123 = vmatprep.mubr.bf16.mxu1 %v1330_v21 }
 0x19a   :  { %1059 = vmatmul.mubr.bf16.gmra.mxu0 %v1327_v12  ;;  %1124 = vmatmul.mubr.bf16.gmra.mxu1 %v1329_v0  ;;  %v532_v39 = vmul.f32 %v1543_v42, %v500_v7  ;;  %v534_v30 = vmul.f32 %v1543_v42, %v502_v28  ;;  %v531_v55 = vmul.f32 %v1543_v42, %v499_v16 }
 0x19b   :  { %v533_v22 = vmul.f32 %v1543_v42, %v501_v58 }
 0x19c   :  { %v1545_v52 = vpop.eup %1544 }
 0x19d   :  { %v536_v40 = vmul.f32 %v1545_v52, %v504_v43  ;;  %v538_v4 = vmul.f32 %v1545_v52, %v506_v46  ;;  %v535_v25 = vmul.f32 %v1545_v52, %v503_v29  ;;  %v537_v47 = vmul.f32 %v1545_v52, %v505_v51 }
 0x19f   :  { %v1332_v61 = vpack.c.bf16 %v536_v40, %v532_v39  ;;  %v1334_v57 = vpack.c.bf16 %v538_v4, %v534_v30  ;;  %v1331_v62 = vpack.c.bf16 %v535_v25, %v531_v55  ;;  %v1333_v2 = vpack.c.bf16 %v537_v47, %v533_v22 }
 0x1a1   :  { %v1547_v59 = vpop.eup %1546  ;;  %1066 = vmatprep.mubr.bf16.mxu0 %v1332_v61  ;;  %1131 = vmatprep.mubr.bf16.mxu1 %v1334_v57 }
 0x1a2   :  { %1067 = vmatmul.mubr.bf16.gmra.mxu0 %v1331_v62  ;;  %1132 = vmatmul.mubr.bf16.gmra.mxu1 %v1333_v2  ;;  %v540_v23 = vmul.f32 %v1547_v59, %v508_v45  ;;  %v542_v15 = vmul.f32 %v1547_v59, %v510_v49  ;;  %v539_v17 = vmul.f32 %v1547_v59, %v507_v56 }
 0x1a3   :  { %v541_v63 = vmul.f32 %v1547_v59, %v509_v1 }
 0x1a4   :  { %v1549_v14 = vpop.eup %1548 }
 0x1a5   :  { %v544_v34 = vmul.f32 %v1549_v14, %v512_v3  ;;  %v546_v35 = vmul.f32 %v1549_v14, %v514_v5  ;;  %v543_v10 = vmul.f32 %v1549_v14, %v511_v18  ;;  %v545_v6 = vmul.f32 %v1549_v14, %v513_v11 }
 0x1a7   :  { %v1336_v24 = vpack.c.bf16 %v544_v34, %v540_v23  ;;  %v1338_v48 = vpack.c.bf16 %v546_v35, %v542_v15  ;;  %v1335_v27 = vpack.c.bf16 %v543_v10, %v539_v17  ;;  %v1337_v31 = vpack.c.bf16 %v545_v6, %v541_v63 }
 0x1a9   :  { %1074 = vmatprep.mubr.bf16.mxu0 %v1336_v24  ;;  %1139 = vmatprep.mubr.bf16.mxu1 %v1338_v48 }
 0x1aa   :  { %1075 = vmatmul.mubr.bf16.gmra.mxu0 %v1335_v27  ;;  %1140 = vmatmul.mubr.bf16.gmra.mxu1 %v1337_v31 }
 0x251   :  { %v1355_v36 = vpop.f32.mrf.mxu0  ;;  %v1395_v8 = vpop.f32.mrf.mxu1 }
 0x253   :  { %v1356_v53 = vpop.f32.mrf.mxu0  ;;  %v1396_v9 = vpop.f32.mrf.mxu1 }
 0x254   :  { %v1357_v54 = vadd.f32 %v1356_v53, %v1355_v36  ;;  %v1397_v20 = vadd.f32 %v1396_v9, %v1395_v8 }
 0x255   :  { %v1358_v13 = vpop.f32.mrf.mxu0  ;;  %v1398_v32 = vpop.f32.mrf.mxu1 }
 0x256   :  { %v1053_v60 = vadd.f32 %v1357_v54, %v2031_v41 }
 0x257   :  { %v1359_v33 = vpop.f32.mrf.mxu0  ;;  %v1399_v44 = vpop.f32.mrf.mxu1 }
 0x258   :  { %v1118_v26 = vadd.f32 %v1397_v20, %v1053_v60  ;;  %v1360_v38 = vadd.f32 %v1359_v33, %v1358_v13  ;;  %v1400_v19 = vadd.f32 %v1399_v44, %v1398_v32 }
 0x25a   :  { %1149 = vst.msk [vmem:[#allocation3] sm:$0xff] %vm1148_vm1, %v1118_v26  ;;  %v1056_v50 = vadd.f32 %v1360_v38, %v2031_v41  ;;  %v1361_v37 = vpop.f32.mrf.mxu0  ;;  %v1401_v21 = vpop.f32.mrf.mxu1 }
 0x25c   :  { %v1121_v12 = vadd.f32 %v1400_v19, %v1056_v50  ;;  %v1362_v42 = vpop.f32.mrf.mxu0  ;;  %v1402_v0 = vpop.f32.mrf.mxu1 }
 0x25d   :  { %v1363_v7 = vadd.f32 %v1362_v42, %v1361_v37  ;;  %v1403_v43 = vadd.f32 %v1402_v0, %v1401_v21 }
 0x25e   :  { %1150 = vst.msk [vmem:[#allocation3 + $0x8] sm:$0xff] %vm1148_vm1, %v1121_v12  ;;  %v1364_v28 = vpop.f32.mrf.mxu0  ;;  %v1404_v16 = vpop.f32.mrf.mxu1 }
 0x25f   :  { %v1061_v58 = vadd.f32 %v1363_v7, %v2031_v41 }
 0x260   :  { %v1365_v46 = vpop.f32.mrf.mxu0  ;;  %v1405_v29 = vpop.f32.mrf.mxu1 }
 0x261   :  { %v1199_v51 = vld [vmem:[#allocation3] sm:$0xff]  ;;  %v1126_v52 = vadd.f32 %v1403_v43, %v1061_v58  ;;  %v1366_v39 = vadd.f32 %v1365_v46, %v1364_v28  ;;  %v1406_v40 = vadd.f32 %v1405_v29, %v1404_v16 }
 0x262   :  { %1200 = vst [vmem:[%s2073_s5] sm:$0xff] %v1199_v51  ;;  %v1367_v30 = vpop.f32.mrf.mxu0  ;;  %v1407_v55 = vpop.f32.mrf.mxu1 }
 0x263   :  { %1151 = vst.msk [vmem:[#allocation3 + $0x10] sm:$0xff] %vm1148_vm1, %v1126_v52  ;;  %v1064_v22 = vadd.f32 %v1366_v39, %v2031_v41 }
 0x264   :  { %v1368_v4 = vpop.f32.mrf.mxu0  ;;  %v1408_v25 = vpop.f32.mrf.mxu1 }
 0x265   :  { %v1201_v47 = vld [vmem:[#allocation3 + $0x8] sm:$0xff]  ;;  %v1129_v61 = vadd.f32 %v1406_v40, %v1064_v22  ;;  %v1369_v57 = vadd.f32 %v1368_v4, %v1367_v30  ;;  %v1409_v45 = vadd.f32 %v1408_v25, %v1407_v55 }
 0x266   :  { %1202 = vst [vmem:[%s2073_s5 + $0x8] sm:$0xff] %v1201_v47  ;;  %v1370_v62 = vpop.f32.mrf.mxu0  ;;  %v1410_v2 = vpop.f32.mrf.mxu1 }
 0x267   :  { %1152 = vst.msk [vmem:[#allocation3 + $0x18] sm:$0xff] %vm1148_vm1, %v1129_v61  ;;  %v1069_v59 = vadd.f32 %v1369_v57, %v2031_v41 }
 0x268   :  { %v1371_v49 = vpop.f32.mrf.mxu0  ;;  %v1411_v56 = vpop.f32.mrf.mxu1 }
 0x269   :  { %v1134_v1 = vadd.f32 %v1409_v45, %v1069_v59  ;;  %v1372_v3 = vadd.f32 %v1371_v49, %v1370_v62  ;;  %v1412_v23 = vadd.f32 %v1411_v56, %v1410_v2 }
 0x26a   :  { %v1203_v5 = vld [vmem:[#allocation3 + $0x10] sm:$0xff]  ;;  %v1373_v18 = vpop.f32.mrf.mxu0  ;;  %v1413_v11 = vpop.f32.mrf.mxu1 }
 0x26b   :  { %1204 = vst [vmem:[%s2073_s5 + $0x10] sm:$0xff] %v1203_v5  ;;  %1153 = vst.msk [vmem:[#allocation3 + $0x20] sm:$0xff] %vm1148_vm1, %v1134_v1  ;;  %v1072_v14 = vadd.f32 %v1372_v3, %v2031_v41 }
 0x26c   :  { %v1374_v15 = vpop.f32.mrf.mxu0  ;;  %v1414_v17 = vpop.f32.mrf.mxu1 }
 0x26d   :  { %v1137_v63 = vadd.f32 %v1412_v23, %v1072_v14  ;;  %v1375_v34 = vadd.f32 %v1374_v15, %v1373_v18  ;;  %v1415_v48 = vadd.f32 %v1414_v17, %v1413_v11 }
 0x26e   :  { %v1205_v35 = vld [vmem:[#allocation3 + $0x18] sm:$0xff]  ;;  %v1376_v10 = vpop.f32.mrf.mxu0  ;;  %v1416_v6 = vpop.f32.mrf.mxu1 }
 0x26f   :  { %1206 = vst [vmem:[%s2073_s5 + $0x18] sm:$0xff] %v1205_v35  ;;  %1154 = vst.msk [vmem:[#allocation3 + $0x28] sm:$0xff] %vm1148_vm1, %v1137_v63  ;;  %v1077_v24 = vadd.f32 %v1375_v34, %v2031_v41 }
 0x270   :  { %v1377_v27 = vpop.f32.mrf.mxu0  ;;  %v1417_v31 = vpop.f32.mrf.mxu1 }
 0x271   :  { %v1142_v36 = vadd.f32 %v1415_v48, %v1077_v24 }
 0x272   :  { %v1207_v8 = vld [vmem:[#allocation3 + $0x20] sm:$0xff] }
 0x273   :  { %1208 = vst [vmem:[%s2073_s5 + $0x20] sm:$0xff] %v1207_v8  ;;  %1155 = vst.msk [vmem:[#allocation3 + $0x30] sm:$0xff] %vm1148_vm1, %v1142_v36 }
 0x276   :  { %v1209_v53 = vld [vmem:[#allocation3 + $0x28] sm:$0xff] }
 0x277   :  { %1210 = vst [vmem:[%s2073_s5 + $0x28] sm:$0xff] %v1209_v53 }
 0x27a   :  { %v1211_v9 = vld [vmem:[#allocation3 + $0x30] sm:$0xff] }
 0x27b   :  { %1212 = vst [vmem:[%s2073_s5 + $0x30] sm:$0xff] %v1211_v9 }

</bundles_post_ra>
